<compile_context>
chip_gen: v7x
topology: tpu7x:2x2x1
jax: 0.10.0
libtpu: 0.0.40
codegen_flags: <defaults>
</compile_context>

<pallas_src>
import jax
import jax.numpy as jnp
from jax.experimental import pallas as pl
from jax.experimental.pallas import tpu as pltpu

_LANE = 128


def _round_up(n, m):
    return (n + m - 1) // m * m


# ---------------------------------------------------------------------------
# Kernels
# ---------------------------------------------------------------------------
def _head_hidden_kernel(x_ref, w1_ref, shift_ref, w2_ref, b2_ref, o_ref, acc_ref):
    k = pl.program_id(1)

    @pl.when(k == 0)
    def _():
        acc_ref[...] = jnp.zeros_like(acc_ref)

    # Partial product of Linear(n_input -> n_hidden, bias=False); BN scale is
    # already folded into w1. bf16 operands, f32 accumulate on the MXU.
    acc_ref[...] += jnp.dot(
        x_ref[...], w1_ref[...], preferred_element_type=jnp.float32
    )

    @pl.when(k == pl.num_programs(1) - 1)
    def _():
        # Epilogue in f32 on the VPU: BN shift + ReLU, then the small second
        # Linear(n_hidden -> n_classes, bias=True).
        h = jnp.maximum(acc_ref[...] + shift_ref[...], 0.0)
        o_ref[...] = (
            jnp.dot(
                h.astype(w2_ref.dtype), w2_ref[...],
                preferred_element_type=jnp.float32,
            )
            + b2_ref[...]
        ).astype(o_ref.dtype)


def _head_simple_kernel(x_ref, w_ref, b_ref, o_ref):
    k = pl.program_id(1)

    @pl.when(k == 0)
    def _():
        o_ref[...] = jnp.zeros_like(o_ref)

    # Output block is resident across the k axis -> accumulate into it directly.
    o_ref[...] += jnp.dot(
        x_ref[...], w_ref[...], preferred_element_type=jnp.float32
    )

    @pl.when(k == pl.num_programs(1) - 1)
    def _():
        o_ref[...] += b_ref[...]


# ---------------------------------------------------------------------------
# Parameter construction (deterministic, PyTorch-like shapes/init)
# ---------------------------------------------------------------------------
def init_params(key, n_input, n_classes, n_hidden=None):
    if n_hidden is None:
        k1, k2 = jax.random.split(key, 2)
        bound = 1.0 / jnp.sqrt(jnp.float32(n_input))
        w = jax.random.uniform(k1, (n_input, n_classes), jnp.float32, -bound, bound)
        b = jax.random.uniform(k2, (1, n_classes), jnp.float32, -bound, bound)
        return {"w": w, "b": b}
    k1, k2, k3, k4, k5, k6 = jax.random.split(key, 6)
    bound1 = 1.0 / jnp.sqrt(jnp.float32(n_input))
    bound2 = 1.0 / jnp.sqrt(jnp.float32(n_hidden))
    w1 = jax.random.uniform(k1, (n_input, n_hidden), jnp.float32, -bound1, bound1)
    gamma = 1.0 + 0.1 * jax.random.normal(k2, (n_hidden,), jnp.float32)
    beta = 0.1 * jax.random.normal(k3, (n_hidden,), jnp.float32)
    running_mean = 0.05 * jax.random.normal(k4, (n_hidden,), jnp.float32)
    running_var = 1.0 + 0.1 * jax.random.uniform(k5, (n_hidden,), jnp.float32)
    w2 = jax.random.uniform(k6, (n_hidden, n_classes), jnp.float32, -bound2, bound2)
    b2 = jnp.zeros((1, n_classes), jnp.float32)
    return {
        "w1": w1, "gamma": gamma, "beta": beta,
        "running_mean": running_mean, "running_var": running_var,
        "w2": w2, "b2": b2,
    }


# ---------------------------------------------------------------------------
# One-time parameter prep: fold BN scale into W1, pad to lane/tile multiples,
# cast matmul operands to bf16. (Done once at setup, NOT per forward call.)
# ---------------------------------------------------------------------------
def prepare_params(params, n_input, n_classes, n_hidden=None, eps=1e-5, tk=512):
    tk = max(_LANE, _round_up(tk, _LANE))
    k_pad = _round_up(n_input, tk)
    c_pad = _round_up(n_classes, _LANE)

    if n_hidden is None:
        w = jnp.zeros((k_pad, c_pad), jnp.float32)
        w = w.at[:n_input, :n_classes].set(params["w"])
        b = jnp.zeros((1, c_pad), jnp.float32).at[:, :n_classes].set(params["b"])
        return {
            "kind": "simple", "tk": tk, "n_input": n_input,
            "n_classes": n_classes, "k_pad": k_pad, "c_pad": c_pad,
            "w": w.astype(jnp.bfloat16), "b": b,
        }

    h_pad = _round_up(n_hidden, _LANE)
    scale = params["gamma"] / jnp.sqrt(params["running_var"] + eps)
    shift = params["beta"] - params["running_mean"] * scale
    w1_folded = params["w1"] * scale[None, :]  # BN scale folded into W1 columns
    w1 = jnp.zeros((k_pad, h_pad), jnp.float32)
    w1 = w1.at[:n_input, :n_hidden].set(w1_folded)
    sh = jnp.zeros((1, h_pad), jnp.float32).at[:, :n_hidden].set(shift[None, :])
    w2 = jnp.zeros((h_pad, c_pad), jnp.float32)
    w2 = w2.at[:n_hidden, :n_classes].set(params["w2"])
    b2 = jnp.zeros((1, c_pad), jnp.float32).at[:, :n_classes].set(params["b2"])
    return {
        "kind": "hidden", "tk": tk, "n_input": n_input,
        "n_classes": n_classes, "k_pad": k_pad, "h_pad": h_pad, "c_pad": c_pad,
        "w1": w1.astype(jnp.bfloat16), "shift": sh,
        "w2": w2.astype(jnp.bfloat16), "b2": b2,
    }


def _vmem_limit_bytes(tb, tk, hp, cp):
    # Rough per-step working set (double-buffered bf16 streams + resident f32
    # accumulator + epilogue operands), with 2x headroom.  Clamped to a range
    # that is safe on v5e's 16 MiB scoped default and v7x's 64 MiB physical.
    need = (
        2 * tb * tk * 2        # x blocks (bf16, 2 buffers)
        + 2 * tk * hp * 2      # w1 blocks (bf16, 2 buffers)
        + tb * hp * 4          # f32 accumulator
        + 2 * hp * cp * 2      # w2 (bf16)
        + 4 * (hp + cp) * 4    # shift / biases (f32)
        + 2 * tb * cp * 4      # output blocks (f32, 2 buffers)
    )
    return int(min(max(2 * need, 16 << 20), 32 << 20))


# ---------------------------------------------------------------------------
# Wrapper: flatten / pad (glue) + pallas_call (hot path)
# ---------------------------------------------------------------------------
def classification_head(x, prepped):
    B = x.shape[0]
    n_input = prepped["n_input"]
    n_classes = prepped["n_classes"]
    tk, k_pad, c_pad = prepped["tk"], prepped["k_pad"], prepped["c_pad"]

    # Flatten(): NCHW row-major view -> (B, C*H*W); bf16 matmul operand.
    xf = x.reshape(B, -1).astype(jnp.bfloat16)
    assert xf.shape[1] == n_input

    # Pad batch (sublane multiple / TC-split friendly) and K (to tile multiple).
    b_pad = _round_up(max(B, 1), 16)
    tb = b_pad if b_pad <= 128 else 128
    b_pad = _round_up(b_pad, tb)
    xf = jnp.pad(xf, ((0, b_pad - B), (0, k_pad - n_input)))

    nb, nk = b_pad // tb, k_pad // tk

    if prepped["kind"] == "simple":
        flops = 2 * b_pad * k_pad * c_pad
        bytes_accessed = (b_pad * k_pad * 2 + k_pad * c_pad * 2
                          + c_pad * 4 + b_pad * c_pad * 4)
        out = pl.pallas_call(
            _head_simple_kernel,
            out_shape=jax.ShapeDtypeStruct((b_pad, c_pad), jnp.float32),
            grid_spec=pltpu.PrefetchScalarGridSpec(
                num_scalar_prefetch=0,
                grid=(nb, nk),
                in_specs=[
                    pl.BlockSpec((tb, tk), lambda b, k: (b, k)),
                    pl.BlockSpec((tk, c_pad), lambda b, k: (k, 0)),
                    pl.BlockSpec((1, c_pad), lambda b, k: (0, 0)),
                ],
                out_specs=pl.BlockSpec((tb, c_pad), lambda b, k: (b, 0)),
            ),
            compiler_params=pltpu.CompilerParams(
                dimension_semantics=("parallel", "arbitrary"),
                vmem_limit_bytes=_vmem_limit_bytes(tb, tk, 0, c_pad),
            ),
            cost_estimate=pl.CostEstimate(
                flops=flops, transcendentals=0, bytes_accessed=bytes_accessed),
        )(xf, prepped["w"], prepped["b"])
        return out[:B, :n_classes]

    # Hidden-MLP path
    hp = prepped["h_pad"]
    flops = 2 * b_pad * k_pad * hp + 2 * b_pad * hp * c_pad
    bytes_accessed = (b_pad * k_pad * 2 + k_pad * hp * 2 + hp * c_pad * 2
                      + (hp + c_pad) * 4 + b_pad * c_pad * 4)
    out = pl.pallas_call(
        _head_hidden_kernel,
        out_shape=jax.ShapeDtypeStruct((b_pad, c_pad), jnp.float32),
        grid_spec=pltpu.PrefetchScalarGridSpec(
            num_scalar_prefetch=0,
            grid=(nb, nk),
            in_specs=[
                pl.BlockSpec((tb, tk), lambda b, k: (b, k)),
                pl.BlockSpec((tk, hp), lambda b, k: (k, 0)),
                pl.BlockSpec((1, hp), lambda b, k: (0, 0)),
                pl.BlockSpec((hp, c_pad), lambda b, k: (0, 0)),
                pl.BlockSpec((1, c_pad), lambda b, k: (0, 0)),
            ],
            out_specs=pl.BlockSpec((tb, c_pad), lambda b, k: (b, 0)),
            scratch_shapes=[pltpu.VMEM((tb, hp), jnp.float32)],
        ),
        compiler_params=pltpu.CompilerParams(
            dimension_semantics=("parallel", "arbitrary"),
            vmem_limit_bytes=_vmem_limit_bytes(tb, tk, hp, c_pad),
        ),
        cost_estimate=pl.CostEstimate(
            flops=flops, transcendentals=0, bytes_accessed=bytes_accessed),
    )(xf, prepped["w1"], prepped["shift"], prepped["w2"], prepped["b2"])
    return out[:B, :n_classes]


# ---------------------------------------------------------------------------
# Pure-JAX f32 reference for correctness check (original, unfolded params)
# ---------------------------------------------------------------------------
def reference(x, params, n_classes, n_hidden=None, eps=1e-5):
    B = x.shape[0]
    xf = x.reshape(B, -1).astype(jnp.float32)
    if n_hidden is None:
        return xf @ params["w"] + params["b"]
    h = xf @ params["w1"]
    h = (h - params["running_mean"]) / jnp.sqrt(params["running_var"] + eps)
    h = h * params["gamma"] + params["beta"]
    h = jnp.maximum(h, 0.0)
    return h @ params["w2"] + params["b2"]


if __name__ == "__main__":
    key = jax.random.PRNGKey(0)
    kx, kp1, kp2 = jax.random.split(key, 3)

    # Small shapes implied by the forward: NCHW image features -> flatten.
    B, C, H, W = 2, 4, 16, 16
    n_input = C * H * W          # 1024
    n_hidden = 32
    n_classes = 10

    x = jax.random.normal(kx, (B, C, H, W), jnp.float32)

    # Path 1: hidden MLP head (Flatten -> Dropout -> Linear -> BN -> ReLU -> Dropout -> Linear)
    params_h = init_params(kp1, n_input, n_classes, n_hidden=n_hidden)
    prepped_h = prepare_params(params_h, n_input, n_classes, n_hidden=n_hidden, tk=256)
    out_h = classification_head(x, prepped_h)
    jax.block_until_ready(out_h)
    ref_h = reference(x, params_h, n_classes, n_hidden=n_hidden)
    assert out_h.shape == (B, n_classes)
    # bf16 matmul operands with f32 accumulate -> loosened tolerance vs f32 ref.
    assert jnp.allclose(out_h, ref_h, atol=2e-2, rtol=2e-2)

    # Path 2: n_hidden=None (Flatten -> Dropout -> Linear)
    params_s = init_params(kp2, n_input, n_classes, n_hidden=None)
    prepped_s = prepare_params(params_s, n_input, n_classes, n_hidden=None, tk=256)
    out_s = classification_head(x, prepped_s)
    jax.block_until_ready(out_s)
    ref_s = reference(x, params_s, n_classes, n_hidden=None)
    assert out_s.shape == (B, n_classes)
    assert jnp.allclose(out_s, ref_s, atol=2e-2, rtol=2e-2)

    print("KERNEL_OK")
</pallas_src>

<mosaic_0001>
module attributes {stable_mosaic.version = 11 : i64} {
  func.func @_head_hidden_kernel(%arg0: i32, %arg1: i32, %arg2: memref<16x256xbf16, #tpu.memory_space<vmem>>, %arg3: memref<256x128xbf16, #tpu.memory_space<vmem>>, %arg4: memref<1x128xf32, #tpu.memory_space<vmem>>, %arg5: memref<128x128xbf16, #tpu.memory_space<vmem>>, %arg6: memref<1x128xf32, #tpu.memory_space<vmem>>, %arg7: memref<16x128xf32, #tpu.memory_space<vmem>>, %arg8: memref<16x128xf32, #tpu.memory_space<vmem>>) attributes {dimension_semantics = [#tpu.dimension_semantics<parallel>, #tpu.dimension_semantics<arbitrary>], iteration_bounds = array<i64: 1, 4>, scalar_prefetch = 0 : i64, scratch_operands = 1 : i64, tpu.core_type = #tpu.core_type<tc>, window_params = [{transform_indices = @transform_0, window_bounds = array<i64: 16, 256>}, {transform_indices = @transform_1, window_bounds = array<i64: 256, 128>}, {pipeline_mode = #tpu.pipeline_mode<synchronous>, transform_indices = @transform_2, window_bounds = array<i64: 1, 128>}, {pipeline_mode = #tpu.pipeline_mode<synchronous>, transform_indices = @transform_3, window_bounds = array<i64: 128, 128>}, {pipeline_mode = #tpu.pipeline_mode<synchronous>, transform_indices = @transform_4, window_bounds = array<i64: 1, 128>}, {transform_indices = @transform_5, window_bounds = array<i64: 16, 128>}]} {
    %c0_i32 = arith.constant 0 : i32
    %0 = arith.cmpi eq, %arg1, %c0_i32 : i32
    %1 = arith.extui %0 : i1 to i32
    %c0_i32_0 = arith.constant 0 : i32
    %2 = arith.cmpi ne, %1, %c0_i32_0 : i32
    scf.if %2 {
      %cst_9 = arith.constant 0.000000e+00 : f32
      %12 = vector.broadcast %cst_9 : f32 to vector<16x128xf32>
      %c0_10 = arith.constant 0 : index
      %c0_11 = arith.constant 0 : index
      %13 = vector.load %arg8[%c0_10, %c0_11] : memref<16x128xf32, #tpu.memory_space<vmem>>, vector<16x128xf32>
      tpu.vector_store %arg8[%c0_10, %c0_11], %12 {strides = array<i32>} : memref<16x128xf32, #tpu.memory_space<vmem>>, vector<16x128xf32>,
    } else {
    }
    %c0 = arith.constant 0 : index
    %c0_1 = arith.constant 0 : index
    %3 = vector.load %arg8[%c0, %c0_1] : memref<16x128xf32, #tpu.memory_space<vmem>>, vector<16x128xf32>
    %c0_2 = arith.constant 0 : index
    %c0_3 = arith.constant 0 : index
    %4 = vector.load %arg2[%c0_2, %c0_3] : memref<16x256xbf16, #tpu.memory_space<vmem>>, vector<16x256xbf16>
    %c0_4 = arith.constant 0 : index
    %c0_5 = arith.constant 0 : index
    %5 = vector.load %arg3[%c0_4, %c0_5] : memref<256x128xbf16, #tpu.memory_space<vmem>>, vector<256x128xbf16>
    %cst = arith.constant dense<0.000000e+00> : vector<16x128xf32>
    %6 = tpu.matmul %4, %5, %cst {dimension_numbers = #tpu.dot_dimension_numbers<[1], [0], [0], [1], [0, 0, 1, 1], [], []>} : vector<16x256xbf16>, vector<256x128xbf16>, vector<16x128xf32> -> vector<16x128xf32>
    %7 = arith.addf %3, %6 : vector<16x128xf32>
    %c0_6 = arith.constant 0 : index
    %c0_7 = arith.constant 0 : index
    %8 = vector.load %arg8[%c0_6, %c0_7] : memref<16x128xf32, #tpu.memory_space<vmem>>, vector<16x128xf32>
    tpu.vector_store %arg8[%c0_6, %c0_7], %7 {strides = array<i32>} : memref<16x128xf32, #tpu.memory_space<vmem>>, vector<16x128xf32>,
    %c3_i32 = arith.constant 3 : i32
    %9 = arith.cmpi eq, %arg1, %c3_i32 : i32
    %10 = arith.extui %9 : i1 to i32
    %c0_i32_8 = arith.constant 0 : i32
    %11 = arith.cmpi ne, %10, %c0_i32_8 : i32
    scf.if %11 {
      %c0_9 = arith.constant 0 : index
      %c0_10 = arith.constant 0 : index
      %12 = vector.load %arg8[%c0_9, %c0_10] : memref<16x128xf32, #tpu.memory_space<vmem>>, vector<16x128xf32>
      %c0_11 = arith.constant 0 : index
      %c0_12 = arith.constant 0 : index
      %13 = vector.load %arg4[%c0_11, %c0_12] : memref<1x128xf32, #tpu.memory_space<vmem>>, vector<1x128xf32>
      %14 = vector.broadcast %13 : vector<1x128xf32> to vector<16x128xf32>
      %15 = arith.addf %12, %14 : vector<16x128xf32>
      %cst_13 = arith.constant 0.000000e+00 : f32
      %16 = vector.broadcast %cst_13 : f32 to vector<16x128xf32>
      %17 = arith.maximumf %15, %16 : vector<16x128xf32>
      %18 = arith.truncf %17 : vector<16x128xf32> to vector<16x128xbf16>
      %c0_14 = arith.constant 0 : index
      %c0_15 = arith.constant 0 : index
      %19 = vector.load %arg5[%c0_14, %c0_15] : memref<128x128xbf16, #tpu.memory_space<vmem>>, vector<128x128xbf16>
      %cst_16 = arith.constant dense<0.000000e+00> : vector<16x128xf32>
      %20 = tpu.matmul %18, %19, %cst_16 {dimension_numbers = #tpu.dot_dimension_numbers<[1], [0], [0], [1], [0, 0, 1, 1], [], []>} : vector<16x128xbf16>, vector<128x128xbf16>, vector<16x128xf32> -> vector<16x128xf32>
      %c0_17 = arith.constant 0 : index
      %c0_18 = arith.constant 0 : index
      %21 = vector.load %arg6[%c0_17, %c0_18] : memref<1x128xf32, #tpu.memory_space<vmem>>, vector<1x128xf32>
      %22 = vector.broadcast %21 : vector<1x128xf32> to vector<16x128xf32>
      %23 = arith.addf %20, %22 : vector<16x128xf32>
      %c0_19 = arith.constant 0 : index
      %c0_20 = arith.constant 0 : index
      %24 = vector.load %arg7[%c0_19, %c0_20] : memref<16x128xf32, #tpu.memory_space<vmem>>, vector<16x128xf32>
      tpu.vector_store %arg7[%c0_19, %c0_20], %23 {strides = array<i32>} : memref<16x128xf32, #tpu.memory_space<vmem>>, vector<16x128xf32>,
    } else {
    }
    return
  }
  func.func @transform_0(%arg0: i32, %arg1: i32) -> (i32, i32) {
    %c0_i32 = arith.constant 0 : i32
    return %arg0, %arg1 : i32, i32
  }
  func.func @transform_1(%arg0: i32, %arg1: i32) -> (i32, i32) {
    %c0_i32 = arith.constant 0 : i32
    %c0_i32_0 = arith.constant 0 : i32
    return %arg1, %c0_i32 : i32, i32
  }
  func.func @transform_2(%arg0: i32, %arg1: i32) -> (i32, i32) {
    %c0_i32 = arith.constant 0 : i32
    %c0_i32_0 = arith.constant 0 : i32
    %c0_i32_1 = arith.constant 0 : i32
    return %c0_i32, %c0_i32_0 : i32, i32
  }
  func.func @transform_3(%arg0: i32, %arg1: i32) -> (i32, i32) {
    %c0_i32 = arith.constant 0 : i32
    %c0_i32_0 = arith.constant 0 : i32
    %c0_i32_1 = arith.constant 0 : i32
    return %c0_i32, %c0_i32_0 : i32, i32
  }
  func.func @transform_4(%arg0: i32, %arg1: i32) -> (i32, i32) {
    %c0_i32 = arith.constant 0 : i32
    %c0_i32_0 = arith.constant 0 : i32
    %c0_i32_1 = arith.constant 0 : i32
    return %c0_i32, %c0_i32_0 : i32, i32
  }
  func.func @transform_5(%arg0: i32, %arg1: i32) -> (i32, i32) {
    %c0_i32 = arith.constant 0 : i32
    %c0_i32_0 = arith.constant 0 : i32
    return %arg0, %c0_i32 : i32, i32
  }
}

</mosaic_0001>

<bundles_post_ra>
// kernel: tpu_custom_call.1
= control target key start
LH: loop header
LB: loop body
LE: loop exit
PB: predicated region body
PF: predicated region fallthrough
CT: control target
= control target key end

     0   :  { %s1442_s0 = inlined_call_operand.hbm [shape: bf16[16,1024], index: 0, kind: input, shape index: {}]   ;;  %s1443_s1 = inlined_call_operand.hbm [shape: bf16[1024,128], index: 1, kind: input, shape index: {}]   ;;  %s1444_s2 = inlined_call_operand.vmem [shape: f32[1,128], index: 2, kind: input, shape index: {}]   ;;  %s1445_s3 = inlined_call_operand.hbm [shape: bf16[128,128], index: 3, kind: input, shape index: {}]   ;;  %s1446_s4 = inlined_call_operand.vmem [shape: f32[1,128], index: 4, kind: input, shape index: {}]   ;;  %s1447_s5 = inlined_call_operand.hbm [shape: f32[16,128], index: 5, kind: output, shape index: {}]  }
   0x1   :  { %1455 = sst [smem:[#allocation15_spill]] %s1442_s0 }
   0x2   :  { %1456 = sst [smem:[#allocation16_spill]] %s1445_s3 }
   0x3   :  { %10 = vsyncpa [#allocation4], 0 }
   0x4   :  { %12 = vsyncpa [#allocation4 + $0x1], 0 }
   0x5   :  { %13 = vsyncpa [#allocation7], 0 }
   0x6   :  { %15 = vsyncpa [#allocation7 + $0x1], 0 }
   0x7   :  { %16 = vsyncpa [#allocation5], 0  ;;  %s1183_s18 = smov 0   ;;  %s1185_s19 = smov 0  }
   0x8   :  { %s1187_s20 = smov 0   ;;  %s1189_s21 = smov 0  }
   0x9   :  { %s1191_s22 = smov 0   ;;  %s1193_s23 = smov 0  }
   0xa LB: > { %s1212_s24 = sadd.s32 4294967295, %s1137_s23   ;;  %s43_s25 = sadd.s32 1, %s1125_s20  ;;  %s1137_s23 = sphi %s1193_s23, %s22_s23   ;;  %s1133_s22 = sphi %s1191_s22, %s1477_s22   ;;  %s1129_s21 = sphi %s1189_s21, %s1476_s21   ;;  %s1125_s20 = sphi %s1187_s20, %s1475_s20   ;;  %s1121_s19 = sphi %s1185_s19, %s1474_s19   ;;  %s1117_s18 = sphi %s1183_s18, %s1473_s18  }
   0xb   : > { %p50_p0 = scmp.ne.s32.totalorder %s1125_s20, %s1121_s19  ;;  %p51_p1 = scmp.eq.s32.totalorder %s1137_s23, 0 }
   0xc   : > { %p56_p2 = scmp.ne.s32.totalorder %s1121_s19, %s1117_s18  ;;  %p1448_p3 = scmp.eq.s32.totalorder %s1212_s24, 0 }
   0xd   : > { %p52_p4 = por %p51_p1, %p50_p0  ;;  %p746_p5 = scmp.ge.s32.totalorder %s1137_s23, 1 }
   0xe   : > { %p1223_p6 = por %p1448_p3, %p56_p2  ;;  %p182_p7 = scmp.lt.s32.totalorder %s1137_s23, 5 }
   0xf   : > { %s1139_s28 = smov [#allocation8]   ;;  %p870_p10 = scmp.lt.s32.totalorder %s1137_s23, 4 }
  0x10   : > { %s1457_s26 = scalar_select %p1223_p6, 1, 0 }
  0x11   : > { %p1228_p8 = pnand %p746_p5, %p182_p7  ;;  %s197_s29 = sshll.u32 %s1139_s28, 4  ;;  %s198_s29 = int_to_ptr.vmem [resolvable:$true] %s197_s29 }
  0x12   : > { %p1241_p12 = pnand %p870_p10, %p52_p4  ;;  %s31_s7 = sadd.s32 1, %s1133_s22 }
  0x13   : > { %s1458_s27 = scalar_select %p1228_p8, 1, 0 }
  0x14   : > { %p858_p9 = pneg %p1228_p8  ;;  %s1461_s3 = sld [smem:[#allocation16_spill]] }
  0x15   : > { %s1460_s6 = scalar_select %p1241_p12, 1, 0 }
  0x16   : > { %p1237_p11 = pnand %p858_p9, %p1448_p3 }
  0x18   : > { %p963_p0 = pneg %p1237_p11 }
  0x1a   : > { %s961_s10 = scalar_lea.hbm %s1461_s3, 1024 }
  0x1b   : > { %p962_p13 = scmp.ne.s32.totalorder %s1461_s3, %s961_s10  ;;  %p968_p4 = scmp.lt.u32.totalorder %s961_s10, %s1461_s3 }
  0x1d   : > { %p964_p1 = pnand %p963_p0, %p962_p13 }
  0x1f   : > { %p965_p2 = pneg %p964_p1 }
  0x21   : > { %p970_p5 = pnand %p968_p4, %p965_p2 }
  0x23   : > { %973 = shalt.err (!%p970_p5)
}
  0x24   : > { %s974_s15 = scalar_lea.vmem %s198_s29, 1024  ;;  %p982_p3 = scmp.lt.s32.totalorder %s198_s29, %s198_s29 }
  0x25   : > { %p975_p7 = scmp.ne.s32.totalorder %s198_s29, %s974_s15  ;;  %p983_p6 = scmp.lt.s32.totalorder %s974_s15, %s974_s15 }
  0x27   : > { %p977_p9 = pnand %p975_p7, %p963_p0  ;;  %p984_p8 = por %p983_p6, %p982_p3 }
  0x29   : > { %p978_p10 = pneg %p977_p9 }
  0x2b   : > { %p985_p12 = pnand %p984_p8, %p978_p10 }
  0x2d   : > { %988 = shalt.err (!%p985_p12)
}
  0x2e   : > { %s1452_s16 = smov 64   ;;  %s1453_s17 = smov 4  }
  0x2f   : > { %861 = dma.hbm_to_vmem [thread:$0]  (!%p1237_p11), %s1461_s3, 1024, %s198_s29, [#allocation7], %s1452_s16, %s1452_s16, %s1453_s17  }
  0x30   : > { %p32_p3 = scmp.ge.s32.totalorder %s31_s7, 4  ;;  %s1266_s8 = sand.u32 1, %s1125_s20  }
  0x31   : > { %s793_s9 = sshll.u32 %s1133_s22, 7  ;;  %s749_s10 = sshll.u32 %s1266_s8, 4 }
  0x32   : > { %s1479_s7 = smov (%p32_p3, %s31_s7), 0  ;;  %s1463_s0 = sld [smem:[#allocation15_spill]] }
  0x33   : > { %1462 = sst [smem:[#allocation14_spill]] %s1479_s7  ;;  %s39_s30 = ssub.s32 %s1133_s22, %s1479_s7 }
  0x34   : > { %p41_p6 = scmp.eq.s32.totalorder %s39_s30, 0  ;;  %s218_s29 = scalar_lea.vmem [#allocation3], %s749_s10 }
  0x35   : > { %s228_s14 = sshll.u32 %s218_s29, 4  ;;  %s215_s28 = scalar_lea.sflag [#allocation4], %s1266_s8  ;;  %s1284_s14 = int_to_ptr.vmem [resolvable:$true] %s228_s14 }
  0x36   : > { %s1282_s15 = scalar_select %p41_p6, %s1125_s20, %s43_s25  }
  0x37   : > { %p1464_p11 = scmp.ne.s32.totalorder %s1460_s6, 0 }
  0x38   : > { %s1277_s13 = scalar_lea.hbm %s1463_s0, %s793_s9  ;;  %s994_s10 = scalar_lea.hbm %s1463_s0, 1024 }
  0x39   : > { %s989_s16 = scalar_lea.hbm %s1277_s13, 256  ;;  %p991_p12 = pneg %p1464_p11 }
  0x3a   : > { %p990_p8 = scmp.ne.s32.totalorder %s1277_s13, %s989_s16  ;;  %p995_p1 = scmp.lt.u32.totalorder %s1277_s13, %s1463_s0 }
  0x3b   : > { %p996_p2 = scmp.lt.u32.totalorder %s994_s10, %s989_s16  ;;  %p998_p5 = scmp.lt.u32.totalorder %s989_s16, %s1277_s13 }
  0x3c   : > { %p992_p13 = pnand %p991_p12, %p990_p8 }
  0x3d   : > { %p997_p4 = por %p996_p2, %p995_p1 }
  0x3e   : > { %p993_p0 = pneg %p992_p13 }
  0x3f   : > { %p999_p7 = por %p998_p5, %p997_p4 }
  0x41   : > { %p1000_p9 = pnand %p999_p7, %p993_p0 }
  0x43   : > { %1003 = shalt.err (!%p1000_p9)
}
  0x44   : > { %s1004_s25 = scalar_lea.vmem %s1284_s14, 256  ;;  %s1142_s29 = smov [#allocation3]  }
  0x45   : > { %p1005_p10 = scmp.ne.s32.totalorder %s1284_s14, %s1004_s25  ;;  %s1009_s9 = sshll.u32 %s1142_s29, 4  ;;  %s1010_s9 = int_to_ptr.vmem [resolvable:$false] %s1009_s9 }
  0x46   : > { %s1011_s30 = scalar_lea.vmem %s1010_s9, 512  ;;  %p1012_p8 = scmp.lt.s32.totalorder %s1284_s14, %s1010_s9 }
  0x47   : > { %p1007_p3 = pnand %p1005_p10, %p991_p12  ;;  %p1013_p13 = scmp.lt.s32.totalorder %s1011_s30, %s1004_s25 }
  0x49   : > { %p1008_p6 = pneg %p1007_p3  ;;  %p1014_p1 = por %p1013_p13, %p1012_p8 }
  0x4b   : > { %p1015_p2 = pnand %p1014_p1, %p1008_p6 }
  0x4d   : > { %1018 = shalt.err (!%p1015_p2)
}
  0x4e   : > { %s1143_s16 = smov 512   ;;  %s1144_s10 = smov 128  }
  0x4f   : > { %s1145_s11 = smov 8   ;;  %s752_s12 = sshll.u32 %s1266_s8, 7 }
  0x50   : > { %865 = dma.hbm_to_vmem [thread:$0]  (!%p1464_p11), %s1277_s13, 256, %s1284_s14, %s215_s28, %s1143_s16, %s1144_s10, %s1145_s11  }
  0x51   : > { %s794_s29 = sshll.u32 %s1133_s22, 11  ;;  %s242_s17 = scalar_lea.vmem [#allocation6], %s752_s12 }
  0x52   : > { %s1320_s30 = scalar_lea.hbm %s1443_s1, %s794_s29  ;;  %s249_s18 = sshll.u32 %s242_s17, 4  ;;  %s1322_s18 = int_to_ptr.vmem [resolvable:$true] %s249_s18 }
  0x53   : > { %s1465_s0 = sand.u32 1, %s1137_s23   ;;  %s1019_s7 = scalar_lea.hbm %s1320_s30, 2048 }
  0x54   : > { %s1326_s3 = scalar_lea.sflag [#allocation7], %s1465_s0  ;;  %p1020_p0 = scmp.ne.s32.totalorder %s1320_s30, %s1019_s7 }
  0x55   : > { %s1024_s14 = scalar_lea.hbm %s1443_s1, 8192  ;;  %p1025_p7 = scmp.lt.u32.totalorder %s1320_s30, %s1443_s1 }
  0x56   : > { %p1022_p4 = pnand %p1020_p0, %p991_p12  ;;  %p1026_p9 = scmp.lt.u32.totalorder %s1024_s14, %s1019_s7 }
  0x57   : > { %p1028_p3 = scmp.lt.u32.totalorder %s1019_s7, %s1320_s30 }
  0x58   : > { %p1023_p5 = pneg %p1022_p4  ;;  %p1027_p10 = por %p1026_p9, %p1025_p7 }
  0x5a   : > { %p1029_p6 = por %p1028_p3, %p1027_p10 }
  0x5c   : > { %p1030_p8 = pnand %p1029_p6, %p1023_p5 }
  0x5e   : > { %1033 = shalt.err (!%p1030_p8)
}
  0x5f   : > { %s1034_s0 = scalar_lea.vmem %s1322_s18, 2048  ;;  %s1146_s17 = smov [#allocation6]  }
  0x60   : > { %p1035_p13 = scmp.ne.s32.totalorder %s1322_s18, %s1034_s0  ;;  %s1039_s10 = sshll.u32 %s1146_s17, 4  ;;  %s1040_s10 = int_to_ptr.vmem [resolvable:$false] %s1039_s10 }
  0x61   : > { %s1041_s11 = scalar_lea.vmem %s1040_s10, 4096  ;;  %p1042_p0 = scmp.lt.s32.totalorder %s1322_s18, %s1040_s10 }
  0x62   : > { %p1037_p1 = pnand %p1035_p13, %p991_p12  ;;  %p1043_p4 = scmp.lt.s32.totalorder %s1041_s11, %s1034_s0 }
  0x64   : > { %p1038_p2 = pneg %p1037_p1  ;;  %p1044_p7 = por %p1043_p4, %p1042_p0 }
  0x66   : > { %p1045_p9 = pnand %p1044_p7, %p1038_p2 }
  0x68   : > { %1048 = shalt.err (!%p1045_p9)
}
  0x69   : > { %s1466_s7 = smov 4   ;;  %s1467_s12 = smov 64  }
  0x6a   : > { %868 = dma.hbm_to_vmem [thread:$0]  (!%p1464_p11), %s1320_s30, 2048, %s1322_s18, %s1326_s3, %s1467_s12, %s1467_s12, %s1466_s7  }
  0x6b   : > { %p1468_p12 = scmp.ne.s32.totalorder %s1458_s27, 0 }
  0x6c   : > { %s263_s29 = sand.u32 (!%p1468_p12), 1, %s1121_s19   ;;  %p1469_p5 = scmp.ne.s32.totalorder (!%p1468_p12), %s1457_s26, 0 }
  0x6d   : > { %261 = sbr.rel (%p1468_p12) target bundleno = 641 (0x281), region = 40  ;;  %s756_s25 = sshll.u32 (!%p1468_p12), %s263_s29, 4 }
  0x6e   : > { %s264_s9 = scalar_lea.sflag (!%p1468_p12), [#allocation4], %s263_s29  ;;  %s1358_s8 = scalar_lea.vmem (!%p1468_p12), [#allocation3], %s756_s25 }
  0x74   : > { %1100 = dma.done.wait (%p1469_p5), %s264_s9, 256  }
  0x75   : > { %1102 = vsyncadd (%p1469_p5), %s264_s9, 4294967040  ;;  %s272_s6 = sand.u32 1, %s1212_s24   ;;  %s757_s13 = sshll.u32 %s263_s29, 7 }
  0x76   : > { %s273_s3 = scalar_lea.sflag [#allocation7], %s272_s6  ;;  %s1365_s18 = scalar_lea.vmem [#allocation6], %s757_s13 }
  0x77   : > { %1104 = dma.done.wait (%p1469_p5), %s273_s3, 2048  }
  0x78   : > { %1106 = vsyncadd (%p1469_p5), %s273_s3, 4294965248  ;;  %p1470_p11 = scmp.eq.s32.totalorder %s1212_s24, 0 }
  0x7a   : > { %1108 = dma.done.wait (%p1470_p11), [#allocation7], 1024   ;;  %p1471_p10 = pmov %p1470_p11 }
  0x7b   : > { %p759_p3 = scmp.ne.s32.totalorder %s1129_s21, 0 }
  0x7c   : > { %1110 = vsyncadd (%p1471_p10), [#allocation7], 4294966272  ;;  %v1147_v0 = vmov (!%p759_p3), 0.0  }
  0x7d   : > { %315 = sbr.rel (%p759_p3) target bundleno = 132 (0x84), region = 56  ;;  %316 = vst [vmem:[#allocation2] sm:$0xff] (!%p759_p3), %v1147_v0  ;;  %317 = vst [vmem:[#allocation2 + $0x8] sm:$0xff] (!%p759_p3), %v1147_v0 }
  0x84 PF: > { %v934_v1 = vld [vmem:[%s1365_s18 + $0x40] sm:$0xff]   ;;  %v936_v3 = vld [vmem:[%s1365_s18 + $0x48] sm:$0xff]   ;;  %v938_v5 = vld [vmem:[%s1365_s18 + $0x50] sm:$0xff]   ;;  %p778_p6 = scmp.ne.s32.totalorder %s1129_s21, 3 }
  0x85   : > { %v935_v2 = vld [vmem:[%s1365_s18] sm:$0xff]   ;;  %795 = vmatprep.subr.bf16.mxu0 %v934_v1  ;;  %v937_v4 = vld [vmem:[%s1365_s18 + $0x8] sm:$0xff]   ;;  %v939_v6 = vld [vmem:[%s1365_s18 + $0x10] sm:$0xff]   ;;  %v1148_v30 = vmov (!%p778_p6), 0.0   ;;  %vm1149_vm0 = vmmov (!%p778_p6), 0  }
  0x86   : > { %796 = vmatpush3.bf16.msra.mxu0 %v935_v2  ;;  %v940_v7 = vld [vmem:[%s1365_s18 + $0x58] sm:$0xff]   ;;  %v942_v9 = vld [vmem:[%s1365_s18 + $0x60] sm:$0xff]   ;;  %v944_v11 = vld [vmem:[%s1365_s18 + $0x68] sm:$0xff]  }
  0x87   : > { %797 = vmatprep.subr.bf16.mxu0 %v936_v3  ;;  %v941_v8 = vld [vmem:[%s1365_s18 + $0x18] sm:$0xff]   ;;  %v943_v10 = vld [vmem:[%s1365_s18 + $0x20] sm:$0xff]   ;;  %v945_v13 = vld [vmem:[%s1365_s18 + $0x28] sm:$0xff]  }
  0x88   : > { %v952_v12 = vld [vmem:[%s1358_s8 + $0x4] ss:$8 sps:$4 sm:$0xff]   ;;  %v950_v18 = vld [vmem:[%s1358_s8] ss:$8 sps:$4 sm:$0xff]  }
  0x89   : > { %492 = vmatprep.mubr.bf16.mxu0 %v952_v12  ;;  %v946_v14 = vld [vmem:[%s1365_s18 + $0x70] sm:$0xff]   ;;  %v948_v16 = vld [vmem:[%s1365_s18 + $0x78] sm:$0xff]   ;;  %v953_v29 = vld [vmem:[#allocation8] sm:$0xff] (!%p778_p6)  }
  0x8a   : > { %798 = vmatpush3.bf16.msra.mxu0 %v937_v4  ;;  %v947_v15 = vld [vmem:[%s1365_s18 + $0x30] sm:$0xff]   ;;  %v949_v17 = vld [vmem:[%s1365_s18 + $0x38] sm:$0xff]   ;;  %v954_v31 = vld [vmem:[#allocation8 + $0x8] sm:$0xff] (!%p778_p6)  }
  0x8b   : > { %799 = vmatprep.subr.bf16.mxu0 %v938_v5  ;;  %v318_v20 = vld [vmem:[#allocation2] sm:$0xff]  ;;  %v319_v24 = vld [vmem:[#allocation2 + $0x8] sm:$0xff]  ;;  %v957_v34 = vld [vmem:[#allocation8 + $0x20] sm:$0xff] (!%p778_p6)  }
  0x8c   : > { %v955_v32 = vld [vmem:[#allocation8 + $0x10] sm:$0xff] (!%p778_p6)   ;;  %v956_v33 = vld [vmem:[#allocation8 + $0x18] sm:$0xff] (!%p778_p6)   ;;  %v958_v35 = vld [vmem:[#allocation8 + $0x28] sm:$0xff] (!%p778_p6)  }
  0x8d   : > { %v779_v38 = vld [vmem:[%s1444_s2] ss:$0 sm:$0xff] (!%p778_p6)  ;;  %v960_v44 = vld [vmem:[#allocation8 + $0x38] sm:$0xff] (!%p778_p6)  }
  0x8e   : > { %800 = vmatpush3.bf16.msra.mxu0 %v939_v6  ;;  %v959_v41 = vld [vmem:[#allocation8 + $0x30] sm:$0xff] (!%p778_p6)  }
  0x8f   : > { %801 = vmatprep.subr.bf16.mxu0 %v940_v7  ;;  %v780_v46 = vld [vmem:[%s1446_s4] ss:$0 sm:$0xff] (!%p778_p6) }
  0x92   : > { %802 = vmatpush3.bf16.msra.mxu0 %v941_v8 }
  0x93   : > { %803 = vmatprep.subr.bf16.mxu0 %v942_v9 }
  0x96   : > { %804 = vmatpush3.bf16.msra.mxu0 %v943_v10 }
  0x97   : > { %805 = vmatprep.subr.bf16.mxu0 %v944_v11 }
  0x9a   : > { %806 = vmatpush3.bf16.msra.mxu0 %v945_v13 }
  0x9b   : > { %807 = vmatprep.subr.bf16.mxu0 %v946_v14 }
  0x9e   : > { %808 = vmatpush3.bf16.msra.mxu0 %v947_v15 }
  0x9f   : > { %809 = vmatprep.subr.bf16.mxu0 %v948_v16 }
  0xa2   : > { %810 = vmatpush3.bf16.msra.mxu0 %v949_v17 }
  0xa3   : > { %826 = vmatprep.subr.bf16.mxu0 (!%p778_p6), %v1148_v30 }
  0xa5   : > { %493 = vmatmul.mubr.bf16.vlgmr.msra.gmra.mrb[0].mxu0 %v950_v18 }
  0xa6   : > { %827 = vmatpush3.bf16.msra.mxu0 (!%p778_p6), %v953_v29  ;;  %842 = vmatprep.mubr.msk.bf16.mxu0 (!%p778_p6), %vm1149_vm0, %v1148_v30 }
  0xa7   : > { %828 = vmatprep.subr.bf16.mxu0 (!%p778_p6), %v1148_v30 }
  0xaa   : > { %829 = vmatpush3.bf16.msra.mxu0 (!%p778_p6), %v954_v31 }
  0xab   : > { %830 = vmatprep.subr.bf16.mxu0 (!%p778_p6), %v1148_v30 }
  0xae   : > { %831 = vmatpush3.bf16.msra.mxu0 (!%p778_p6), %v955_v32 }
  0xaf   : > { %832 = vmatprep.subr.bf16.mxu0 (!%p778_p6), %v1148_v30 }
  0xb2   : > { %833 = vmatpush3.bf16.msra.mxu0 (!%p778_p6), %v956_v33 }
  0xb3   : > { %834 = vmatprep.subr.bf16.mxu0 (!%p778_p6), %v1148_v30 }
  0xb6   : > { %835 = vmatpush3.bf16.msra.mxu0 (!%p778_p6), %v957_v34 }
  0xb7   : > { %836 = vmatprep.subr.bf16.mxu0 (!%p778_p6), %v1148_v30 }
  0xba   : > { %837 = vmatpush3.bf16.msra.mxu0 (!%p778_p6), %v958_v35 }
  0xbb   : > { %838 = vmatprep.subr.bf16.mxu0 (!%p778_p6), %v1148_v30 }
  0xbe   : > { %839 = vmatpush3.bf16.msra.mxu0 (!%p778_p6), %v959_v41 }
  0xbf   : > { %840 = vmatprep.subr.bf16.mxu0 (!%p778_p6), %v1148_v30 }
  0xc2   : > { %841 = vmatpush3.bf16.msra.mxu0 (!%p778_p6), %v960_v44 }
 0x178   : > { %v811_v19 = vpop.f32.mrb[0].mxu0 }
 0x179   : > { %v812_v21 = vpop.f32.mrb[1].mxu0 }
 0x17a   : > { %v813_v22 = vadd.f32 %v812_v21, %v811_v19  ;;  %v814_v23 = vpop.f32.mrb[2].mxu0  ;;  %508 = sbr.rel (%p778_p6) target bundleno = 615 (0x267), region = 60 }
 0x17b   : > { %v815_v25 = vpop.f32.mrb[3].mxu0 }
 0x17c   : > { %v501_v26 = vadd.f32 %v813_v22, %v318_v20  ;;  %v816_v27 = vadd.f32 %v815_v25, %v814_v23 }
 0x17e   : > { %503 = vst [vmem:[#allocation2] sm:$0xff] %v501_v26  ;;  %v502_v28 = vadd.f32 %v816_v27, %v319_v24 }
 0x180   : > { %504 = vst [vmem:[#allocation2 + $0x8] sm:$0xff] %v502_v28 }
 0x185   : > { %v509_v36 = vld [vmem:[#allocation2] sm:$0xff] }
 0x186   : > { %v518_v39 = vadd.f32 %v779_v38, %v509_v36 }
 0x187   : > { %v510_v37 = vld [vmem:[#allocation2 + $0x8] sm:$0xff] }
 0x188   : > { %v519_v40 = vadd.f32 %v779_v38, %v510_v37  ;;  %v520_v42 = vmax.f32 %v518_v39, 0.0 }
 0x18a   : > { %v521_v43 = vmax.f32 %v519_v40, 0.0 }
 0x18c   : > { %v522_v45 = vpack.c.bf16 %v521_v43, %v520_v42 }
 0x18e   : > { %843 = vmatmul.mubr.bf16.vlgmr.msra.gmra.mrb[0].mxu0 %v522_v45 }
 0x261   : > { %v628_v47 = vpop.f32.mrb[0].mxu0 }
 0x262   : > { %v629_v48 = vadd.f32 %v780_v46, %v628_v47  ;;  %v844_v49 = vpop.f32.mrb[1].mxu0 }
 0x263   : > { %v631_v50 = vpop.f32.mrb[2].mxu0 }
 0x264   : > { %635 = vst [vmem:[#allocation9] sm:$0xff] %v629_v48  ;;  %v632_v51 = vadd.f32 %v780_v46, %v631_v50  ;;  %v845_v52 = vpop.f32.mrb[3].mxu0 }
 0x266   : > { %636 = vst [vmem:[#allocation9 + $0x8] sm:$0xff] %v632_v51 }
 0x267 PF: > { %p872_p8 = scmp.eq.s32.totalorder %s1212_s24, 3  ;;  %s1150_s14 = smov [#allocation9]  }
 0x268   : > { %s646_s28 = sshll.u32 %s1150_s14, 4  ;;  %s647_s28 = int_to_ptr.vmem [resolvable:$true] %s646_s28 }
 0x269   : > { %s1049_s16 = scalar_lea.vmem %s647_s28, 256  ;;  %p1056_p0 = scmp.lt.s32.totalorder %s647_s28, %s647_s28 }
 0x26a   : > { %p1050_p13 = scmp.ne.s32.totalorder %s647_s28, %s1049_s16  ;;  %p1057_p4 = scmp.lt.s32.totalorder %s1049_s16, %s1049_s16 }
 0x26c   : > { %p1051_p1 = pnand %p1050_p13, %p872_p8  ;;  %p1058_p7 = por %p1057_p4, %p1056_p0 }
 0x26e   : > { %p1052_p2 = pneg %p1051_p1 }
 0x270   : > { %p1059_p9 = pnand %p1058_p7, %p1052_p2 }
 0x272   : > { %1062 = shalt.err (!%p1059_p9)
}
 0x273   : > { %s1063_s10 = scalar_lea.hbm %s1447_s5, 256 }
 0x274   : > { %p1064_p12 = scmp.ne.s32.totalorder %s1447_s5, %s1063_s10  ;;  %p1069_p10 = scmp.lt.u32.totalorder %s1063_s10, %s1447_s5 }
 0x276   : > { %p1065_p5 = pnand %p1064_p12, %p872_p8 }
 0x278   : > { %p1066_p11 = pneg %p1065_p5 }
 0x27a   : > { %p1071_p3 = pnand %p1069_p10, %p1066_p11 }
 0x27c   : > { %1074 = shalt.err (!%p1071_p3)
}
 0x27d   : > { %s1151_s25 = smov 128   ;;  %s1152_s9 = smov 8  }
 0x27e   : > { %855 = dma.vmem_to_hbm [thread:$0]  (%p872_p8), %s647_s28, 256, %s1447_s5, [#allocation5], %s1151_s25, %s1151_s25, %s1152_s9  }
 0x27f   : > { %1112 = dma.done.wait (%p872_p8), [#allocation5], 256  }
 0x280   : > { %1114 = vsyncadd (%p872_p8), [#allocation5], 4294967040 }
 0x281 PF: > { %s22_s23 = sadd.s32 1, %s1137_s23   ;;  %s1472_s13 = sld [smem:[#allocation14_spill]] }
 0x282   : > { %p19_p6 = scmp.ge.s32.totalorder %s22_s23, 6   ;;  %s1473_s18 = smov %s1121_s19 }
 0x283   : > { %s1474_s19 = smov %s1125_s20  ;;  %s1475_s20 = smov %s1282_s15 }
 0x284   : > { %s1476_s21 = smov %s1133_s22  ;;  %21 = sbr.rel (!%p19_p6) target bundleno = 10 (0xa), region = 103 }
 0x287   : > { %s1477_s22 = smov %s1472_s13 }
 0x28b   :  { %662 = vsyncpa [#allocation4], 1 }
 0x28c   :  { %664 = vsyncpa [#allocation4 + $0x1], 1 }
 0x28d   :  { %665 = vsyncpa [#allocation7], 1 }
 0x28e   :  { %667 = vsyncpa [#allocation7 + $0x1], 1 }
 0x28f   :  { %668 = vsyncpa [#allocation5], 1 }
 0x290   :  { %670 = vsyncpa [#allocation5 + $0x1], 1 }

</bundles_post_ra>
